<compile_context>
chip_gen: v7x
topology: tpu7x:2x2x1
jax: 0.10.0
libtpu: 0.0.40
codegen_flags: <defaults>
</compile_context>

<pallas_src>
import functools
import math

import numpy as np
import jax
import jax.numpy as jnp
from jax.experimental import pallas as pl
from jax.experimental.pallas import tpu as pltpu


S1_TAPS = tuple((dy, dx) for dy in (-1, 0, 1) for dx in (-1, 0, 1))   # 3x3, pad 1
S2_OFFSETS = ((0, 0), (0, 1), (1, 0), (1, 1))                         # phase-grid offsets
PHASES = ((0, 0), (0, 1), (1, 0), (1, 1))                             # (py, px) phases


def _round_up(x, m):
    return (x + m - 1) // m * m


def _roll_shift(off, Pp):
    # pltpu.roll follows np.roll: out[p] = in[(p - shift) % n]; we want out[p] = in[p + off].
    return int((-off) % Pp)


# ----------------------------------------------------------------------------
# Static per-lane tables (host / trace-time numpy)
# ----------------------------------------------------------------------------

def _layout_coords(WL, Pp):
    p = np.arange(Pp)
    return p // WL, p % WL


def _inimg_row(WL, H, W, Pp):
    y, x = _layout_coords(WL, Pp)
    return ((y < H) & (x < W)).astype(np.float32).reshape(1, Pp)


def _s1_valid_table(WL, H, W, Pp):
    """Per-tap source-in-image validity for the 3x3 stride-1 conv + final in-image row."""
    y, x = _layout_coords(WL, Pp)
    rows = []
    for dy, dx in S1_TAPS:
        ok = ((y + dy >= 0) & (y + dy < H) & (x + dx >= 0) & (x + dx < W))
        rows.append(ok.astype(np.float32))
    rows.append(((y < H) & (x < W)).astype(np.float32))
    return np.stack(rows, 0)


def _gaussian_tables(g_h, g_v, WL, H, W, Pp):
    """Separable gaussian: per-tap (weight * source validity) for the H then V passes."""
    k = len(g_h)
    c = k // 2
    y, x = _layout_coords(WL, Pp)
    gh, gv, hs, vs = [], [], [], []
    for j in range(k):
        d = j - c
        gh.append(np.float32(g_h[j]) * ((x + d >= 0) & (x + d < W)).astype(np.float32))
        hs.append(_roll_shift(d, Pp))
        gv.append(np.float32(g_v[j]) * ((y + d >= 0) & (y + d < H)).astype(np.float32))
        vs.append(_roll_shift(d * WL, Pp))
    inimg = ((y < H) & (x < W)).astype(np.float32).reshape(1, Pp)
    return np.stack(gh, 0), np.stack(gv, 0), inimg, tuple(hs), tuple(vs)


# ----------------------------------------------------------------------------
# Pallas kernels
# ----------------------------------------------------------------------------

def _tapconv_kernel(x_ref, w_ref, v_ref, sc_ref, sh_ref, o_ref, *, shifts, per_tap):
    """Sum-of-taps conv for one agent: acc += roll(W_t @ x) * valid_t; BN + ReLU epilogue.

    x_ref: (1, CinT, Pp) bf16, w_ref: (T, Cout, CinT) bf16, v_ref: (nv, Pp) f32
    (last row = in-image validity), sc/sh: (Cout, 1) f32, o_ref: (1, Cout, Pp).
    """
    x = x_ref[0]
    acc = None
    for t, s in enumerate(shifts):
        c = jnp.dot(w_ref[t], x, preferred_element_type=jnp.float32)   # MXU, f32 acc
        if s != 0:
            c = pltpu.roll(c, shift=s, axis=1)                         # XLU lane rotate
        if per_tap:
            c = c * v_ref[t:t + 1, :]
        acc = c if acc is None else acc + c
    y = jnp.maximum(acc * sc_ref[...] + sh_ref[...], 0.0)
    nv = v_ref.shape[0]
    y = y * v_ref[nv - 1:nv, :]            # zero out-of-image / lane-pad positions
    o_ref[0] = y.astype(o_ref.dtype)


def _comm_mask_kernel(conf_ref, gh_ref, gv_ref, inimg_ref, ego_ref, mask_ref, sum_ref, *,
                      h_shifts, v_shifts, threshold):
    """Communication threshold mask: sigmoid(max), separable 5x5 gaussian, threshold,
    per-cav mask sums (pre-ego-override), ego override."""
    m = jax.nn.sigmoid(jnp.max(conf_ref[...], axis=1))          # (N, Pp)  (max before sigmoid)
    h = jnp.zeros_like(m)
    for j, s in enumerate(h_shifts):                            # horizontal 5-tap pass
        r = m if s == 0 else pltpu.roll(m, shift=s, axis=1)
        h = h + gh_ref[j:j + 1, :] * r
    sm = jnp.zeros_like(m)
    for j, s in enumerate(v_shifts):                            # vertical 5-tap pass
        r = h if s == 0 else pltpu.roll(h, shift=s, axis=1)
        sm = sm + gv_ref[j:j + 1, :] * r
    mask = jnp.where(sm > threshold, 1.0, 0.0) * inimg_ref[...]
    sum_ref[...] = jnp.sum(mask, axis=1, keepdims=True)         # rate uses pre-override mask
    mask_ref[...] = jnp.maximum(mask, ego_ref[...] * inimg_ref[...]).astype(mask_ref.dtype)


def _attn_kernel(len_ref, start_ref, x_ref, m_ref, o_ref, *, score_scale, Lmax, N):
    """Per-pixel scaled-dot-product attention over the cavs of one group (ego output).

    x_ref: (N, C, Pp) full feature tensor (groups contiguous along N), m_ref: (N, 1, Pp)
    communication mask (folded x*mask), start/len via scalar prefetch (SMEM).
    """
    b = pl.program_id(0)
    Lb = len_ref[b]
    s0 = start_ref[b]
    rows = []
    for l in range(Lmax):                                        # read each cav row once
        idx = jnp.minimum(s0 + l, N - 1)                         # clamp (pad cavs masked below)
        rows.append(x_ref[idx].astype(jnp.float32) * m_ref[idx].astype(jnp.float32))
    q = rows[0]                                                  # ego row (reference takes [0])
    scores = []
    for l in range(Lmax):
        s = jnp.sum(q * rows[l], axis=0, keepdims=True) * score_scale        # (1, Pp)
        s = s + jnp.where(l < Lb, 0.0, -1e30).astype(jnp.float32)            # mask pad cavs
        scores.append(s)
    s = jnp.concatenate(scores, axis=0)                          # (Lmax, Pp)
    mx = jnp.max(s, axis=0, keepdims=True)
    e = jnp.exp(s - mx)
    inv = pl.reciprocal(jnp.sum(e, axis=0, keepdims=True), approx=True)
    acc = None
    for l in range(Lmax):
        term = (e[l:l + 1, :] * inv) * rows[l]
        acc = term if acc is None else acc + term
    o_ref[0] = acc.astype(o_ref.dtype)


def _deconv_kernel(x_ref, w_ref, sc_ref, sh_ref, o_ref):
    """ConvTranspose(k==stride) as a per-pixel matmul + BN + ReLU (depth-to-space in wrapper)."""
    acc = jnp.dot(w_ref[...], x_ref[0], preferred_element_type=jnp.float32)
    y = jnp.maximum(acc * sc_ref[...] + sh_ref[...], 0.0)
    o_ref[0] = y.astype(o_ref.dtype)


# ----------------------------------------------------------------------------
# Pallas wrappers
# ----------------------------------------------------------------------------

def tap_conv(x, wt, valid, scale, shift, shifts, *, per_tap, out_dtype=jnp.bfloat16):
    """x: (N, CinT, Pp) bf16; wt: (T, Cout, CinT) bf16; valid: (nv, Pp) f32.
    Grid over agents ("parallel"); everything for one agent stays resident in VMEM.
    # TODO(synk): for realistic map sizes, tile the lane (spatial) dim with a halo and
    #             raise vmem_limit_bytes per generation instead of whole-agent blocks.
    """
    N, CinT, Pp = x.shape
    T, Cout, _ = wt.shape
    sc = scale.reshape(Cout, 1).astype(jnp.float32)
    sh = shift.reshape(Cout, 1).astype(jnp.float32)
    valid = jnp.asarray(valid, jnp.float32)
    nv = valid.shape[0]
    return pl.pallas_call(
        functools.partial(_tapconv_kernel, shifts=shifts, per_tap=per_tap),
        out_shape=jax.ShapeDtypeStruct((N, Cout, Pp), out_dtype),
        grid=(N,),
        in_specs=[
            pl.BlockSpec((1, CinT, Pp), lambda n: (n, 0, 0)),
            pl.BlockSpec((T, Cout, CinT), lambda n: (0, 0, 0)),
            pl.BlockSpec((nv, Pp), lambda n: (0, 0)),
            pl.BlockSpec((Cout, 1), lambda n: (0, 0)),
            pl.BlockSpec((Cout, 1), lambda n: (0, 0)),
        ],
        out_specs=pl.BlockSpec((1, Cout, Pp), lambda n: (n, 0, 0)),
        compiler_params=pltpu.CompilerParams(dimension_semantics=("parallel",)),
    )(x, wt, valid, sc, sh)


def communication(conf, record_len, starts, threshold, g_h, g_v, HL, WL, H, W, Pp):
    """Communication module, eval/threshold path.  Returns the (N, Pp) mask on the level-0
    feature layout (duplication + x*mask are folded downstream) and the comm rate."""
    N, A, Hc, Wc = conf.shape
    # TODO(synk): bilinear interpolation branch (conf resolution != feature resolution)
    #             is not implemented; confidence maps must be at the level-0 resolution.
    confp = jnp.pad(conf.astype(jnp.float32),
                    ((0, 0), (0, 0), (0, HL - Hc), (0, WL - Wc)))
    confp = confp.reshape(N, A, HL * WL)
    confp = jnp.pad(confp, ((0, 0), (0, 0), (0, Pp - HL * WL)))
    gh, gv, inimg, h_shifts, v_shifts = _gaussian_tables(g_h, g_v, WL, H, W, Pp)
    ego = np.zeros((N, 1), np.float32)
    ego[starts] = 1.0

    mask, sums = pl.pallas_call(
        functools.partial(_comm_mask_kernel, h_shifts=h_shifts, v_shifts=v_shifts,
                          threshold=float(threshold)),
        out_shape=(jax.ShapeDtypeStruct((N, Pp), jnp.bfloat16),
                   jax.ShapeDtypeStruct((N, 1), jnp.float32)),
        in_specs=[pl.BlockSpec(memory_space=pltpu.MemorySpace.VMEM)] * 5,
        out_specs=(pl.BlockSpec(memory_space=pltpu.MemorySpace.VMEM),
                   pl.BlockSpec(memory_space=pltpu.MemorySpace.VMEM)),
    )(confp, jnp.asarray(gh), jnp.asarray(gv), jnp.asarray(inimg), jnp.asarray(ego))

    B = len(record_len)
    rates = []
    for b in range(B):
        s0, L = int(starts[b]), int(record_len[b])
        rates.append(jnp.sum(sums[s0:s0 + L]) / (L * Hc * Wc))
    comm_rate = sum(rates) / B
    return mask, comm_rate


def attention_fusion(x, mask, record_len, starts, Lmax, score_scale):
    """Batched AttentionFusion over groups: (N, C, Pp) features + (N, 1, Pp) mask ->
    (B, C, Pp) ego outputs.  Group slicing happens in-kernel via scalar-prefetched starts."""
    N, C, Pp = x.shape
    B = len(record_len)
    lens = jnp.asarray(record_len, jnp.int32)
    st = jnp.asarray(starts, jnp.int32)
    grid_spec = pltpu.PrefetchScalarGridSpec(
        num_scalar_prefetch=2,
        grid=(B,),
        in_specs=[pl.BlockSpec((N, C, Pp), lambda b, l, s: (0, 0, 0)),
                  pl.BlockSpec((N, 1, Pp), lambda b, l, s: (0, 0, 0))],
        out_specs=pl.BlockSpec((1, C, Pp), lambda b, l, s: (b, 0, 0)),
    )
    return pl.pallas_call(
        functools.partial(_attn_kernel, score_scale=float(score_scale), Lmax=Lmax, N=N),
        out_shape=jax.ShapeDtypeStruct((B, C, Pp), jnp.bfloat16),
        grid_spec=grid_spec,
        compiler_params=pltpu.CompilerParams(dimension_semantics=("parallel",)),
    )(lens, st, x, mask)


def deconv_bn_relu(fused, wmat, scale, shift, k, HL, WL, H, W):
    """ConvTranspose2d(kernel=stride=k, no bias) + BN(eval) + ReLU.
    fused: (B, Cin, Pp) bf16; wmat: (Cout*k*k, Cin) bf16 -> (B, Cout, H*k, W*k) bf16."""
    B, Cin, Pp = fused.shape
    M = wmat.shape[0]
    Cout = M // (k * k)
    sc = scale.reshape(M, 1).astype(jnp.float32)
    sh = shift.reshape(M, 1).astype(jnp.float32)
    y = pl.pallas_call(
        _deconv_kernel,
        out_shape=jax.ShapeDtypeStruct((B, M, Pp), jnp.bfloat16),
        grid=(B,),
        in_specs=[pl.BlockSpec((1, Cin, Pp), lambda b: (b, 0, 0)),
                  pl.BlockSpec((M, Cin), lambda b: (0, 0)),
                  pl.BlockSpec((M, 1), lambda b: (0, 0)),
                  pl.BlockSpec((M, 1), lambda b: (0, 0))],
        out_specs=pl.BlockSpec((1, M, Pp), lambda b: (b, 0, 0)),
        compiler_params=pltpu.CompilerParams(dimension_semantics=("parallel",)),
    )(fused, wmat, sc, sh)
    # depth-to-space (bf16, XLA): (B, Cout*k*k, Pp) -> (B, Cout, H*k, W*k)
    # TODO(synk): fuse this scatter into the kernel's store pattern (element-strided
    #             out_spec) instead of an XLA reshape/transpose pass.
    y = y[:, :, :HL * WL].reshape(B, Cout, k, k, HL, WL)[:, :, :, :, :H, :W]
    y = y.transpose(0, 1, 4, 2, 5, 3).reshape(B, Cout, H * k, W * k)
    return y


# ----------------------------------------------------------------------------
# Parameter init (deterministic, synthetic; all weight prep hoisted here)
# ----------------------------------------------------------------------------

def _build_w4(w):
    """(Cout, Cin, 3, 3) stride-2 conv weight -> per-offset, phase-stacked (4, Cout, 4*Cin)."""
    cout, cin = int(w.shape[0]), int(w.shape[1])
    w4 = jnp.zeros((4, cout, 4 * cin), w.dtype)
    for oi, (oy, ox) in enumerate(S2_OFFSETS):
        for pi, (py, px) in enumerate(PHASES):
            ky, kx = 2 * oy + py, 2 * ox + px
            if ky < 3 and kx < 3:
                w4 = w4.at[oi, :, pi * cin:(pi + 1) * cin].set(w[:, :, ky, kx])
    return w4


def init_params(key, args):
    layer_nums = args['layer_nums']
    num_filters = args['num_filters']
    c_in_list = [64, 128, 128]

    def nrm(k, shape, s=0.05):
        return s * jax.random.normal(k, shape, jnp.float32)

    def bn(k, c, eps=1e-3):
        k1, k2, k3, k4 = jax.random.split(k, 4)
        gamma = 1.0 + 0.1 * jax.random.normal(k1, (c,), jnp.float32)
        beta = 0.1 * jax.random.normal(k2, (c,), jnp.float32)
        mean = 0.05 * jax.random.normal(k3, (c,), jnp.float32)
        var = 1.0 + 0.1 * jnp.abs(jax.random.normal(k4, (c,), jnp.float32))
        scale = gamma / jnp.sqrt(var + eps)
        shift = beta - mean * scale
        return scale, shift

    keys = iter(jax.random.split(key, 64))
    params = {'conv': [], 'dconv': []}
    for i in range(3):
        cin, cout = c_in_list[i], num_filters[i]
        w = nrm(next(keys), (cout, cin, 3, 3))
        sc, sh = bn(next(keys), cout)
        if i == 1:
            # Fold the cat((x*m, x*m)) duplication from Communication into the first
            # level-1 conv: conv(cat(f, f)) == conv_{W[:,:C]+W[:,C:]}(f).
            half = cin // 2
            w = w[:, :half] + w[:, half:]
        w4 = _build_w4(w).astype(jnp.bfloat16)
        level = [(w4, sc, sh)]               # ZeroPad2d(1) + 3x3 stride-2 conv (phase form)
        for _ in range(layer_nums[i]):
            wl = nrm(next(keys), (cout, cout, 3, 3))
            scl, shl = bn(next(keys), cout)
            wt = jnp.stack([wl[:, :, dy + 1, dx + 1] for (dy, dx) in S1_TAPS],
                           axis=0).astype(jnp.bfloat16)
            level.append((wt, scl, shl))
        params['conv'].append(level)

    for idx, (cin, cout, k) in enumerate([(128, 128, 1), (128, 128, 2), (256, 128, 4)]):
        w = nrm(next(keys), (cin, cout, k, k))
        sc, sh = bn(next(keys), cout)
        if idx == 0:
            half = cin // 2
            w = w[:half] + w[half:]          # fold the duplication into DConv[0]
        wmat = jnp.transpose(w, (1, 2, 3, 0)).reshape(cout * k * k, w.shape[0])
        params['dconv'].append((wmat.astype(jnp.bfloat16),
                                jnp.repeat(sc, k * k), jnp.repeat(sh, k * k), k))

    # 1-D separable factors of Communication.init_gaussian_filter (bias = 0).
    ks = args['communication']['gaussian_smooth']['k_size']
    sig = args['communication']['gaussian_smooth']['c_sigma']
    d = np.arange(ks) - ks // 2
    params['g_h'] = np.exp(-np.square(d) / (2.0 * sig ** 2)).astype(np.float32)
    params['g_v'] = (1.0 / (2.0 * np.pi * sig)
                     * np.exp(-np.square(d) / (2.0 * sig ** 2))).astype(np.float32)
    # NOTE: Communication.transfor (1x1 conv 128->64) is never used in forward -> omitted.
    return params


# ----------------------------------------------------------------------------
# Full forward
# ----------------------------------------------------------------------------

def fast2comm_forward(params, args, x, fuse_psm_single, record_len, pairwise_t_matrix):
    """Eval-mode, multi_scale=True, fully=False, threshold path of Fast2comm.forward."""
    B = int(pairwise_t_matrix.shape[0])
    num_filters = args['num_filters']
    threshold = float(args['communication']['threshold'])
    record_len = np.asarray(record_len).astype(np.int64)
    starts = np.concatenate([[0], np.cumsum(record_len)[:-1]]).astype(np.int32)
    Lmax = int(record_len.max())
    N = int(x.shape[0])

    img = x.astype(jnp.bfloat16)             # (N, C, H, W) clean image layout
    pending_mask_img = None                  # level-0 comm mask (image layout) -> level-1 conv
    comm_rate = None
    ups = []
    for i in range(3):
        level = params['conv'][i]

        # ---- stride-2 first layer (ZeroPad2d(1) + 3x3/s2 conv + BN + ReLU), phase form ----
        w4, sc0, sh0 = level[0]
        xin = img if pending_mask_img is None else img * pending_mask_img   # folded x*mask
        pending_mask_img = None
        Hi, Wi = int(xin.shape[2]), int(xin.shape[3])
        if Hi % 2:
            xin = jnp.pad(xin, ((0, 0), (0, 0), (0, 1), (0, 0)))
            Hi += 1
        if Wi % 2:
            xin = jnp.pad(xin, ((0, 0), (0, 0), (0, 0), (0, 1)))
            Wi += 1
        H, W = Hi // 2, Wi // 2              # conv output image size at this level
        HL, WL = H + 1, W + 1                # on-chip layout grid (== phase resolution)
        Pp = _round_up(HL * WL, 128)
        xpad = jnp.pad(xin, ((0, 0), (0, 0), (1, 1), (1, 1)))
        X4 = jnp.concatenate([xpad[:, :, py::2, px::2] for (py, px) in PHASES], axis=1)
        X4 = X4.reshape(N, X4.shape[1], HL * WL)
        X4 = jnp.pad(X4, ((0, 0), (0, 0), (0, Pp - HL * WL))).astype(jnp.bfloat16)
        shifts2 = tuple(_roll_shift(oy * WL + ox, Pp) for (oy, ox) in S2_OFFSETS)
        act = tap_conv(X4, w4, _inimg_row(WL, H, W, Pp), sc0, sh0, shifts2, per_tap=False)

        # ---- stride-1 3x3 conv layers ----
        shifts1 = tuple(_roll_shift(dy * WL + dx, Pp) for (dy, dx) in S1_TAPS)
        valid1 = _s1_valid_table(WL, H, W, Pp)
        for (wt, sc, sh) in level[1:]:
            act = tap_conv(act, wt, valid1, sc, sh, shifts1, per_tap=True)

        # ---- level 0: Communication (threshold/eval path) ----
        if i == 0:
            mask, comm_rate = communication(fuse_psm_single, record_len, starts, threshold,
                                            params['g_h'], params['g_v'], HL, WL, H, W, Pp)
            attn_mask = mask.reshape(N, 1, Pp)
            pending_mask_img = mask[:, :HL * WL].reshape(N, 1, HL, WL)[:, :, :H, :W]
        else:
            attn_mask = jnp.ones((N, 1, Pp), jnp.bfloat16)

        # ---- per-batch AttentionFusion (ego output only) ----
        # Level-0 features are channel-duplicated in the reference -> 2x score factor.
        score_mult = 2.0 if i == 0 else 1.0
        score_scale = score_mult / math.sqrt(num_filters[i])
        fused = attention_fusion(act, attn_mask, record_len, starts, Lmax, score_scale)

        # ---- DConv (ConvTranspose k==stride + BN + ReLU) ----
        wmat, scd, shd, k = params['dconv'][i]
        ups.append(deconv_bn_relu(fused, wmat, scd, shd, k, HL, WL, H, W))

        if i < 2:
            img = act[:, :, :HL * WL].reshape(N, act.shape[1], HL, WL)[:, :, :H, :W]

    x_fuse = jnp.concatenate(ups, axis=1).astype(jnp.float32)
    # TODO(synk): training-mode communication (random topk + gt-box scatter masks) and the
    #             optional backbone.deblocks[-1] head are not implemented.
    return x_fuse, comm_rate


if __name__ == "__main__":
    args = {
        'voxel_size': [0.4, 0.4, 4],
        'downsample_rate': 1,
        'fully': False,
        'multi_scale': True,
        'layer_nums': [1, 1, 1],
        'num_filters': [64, 128, 256],
        'in_channels': 64,
        'communication': {'threshold': 0.01,
                          'gaussian_smooth': {'k_size': 5, 'c_sigma': 1.0}},
    }
    key = jax.random.PRNGKey(0)
    kp, kx, kc = jax.random.split(key, 3)
    params = init_params(kp, args)

    record_len = np.array([2, 2], dtype=np.int64)      # B=2 groups, 2 cavs each
    N = int(record_len.sum())
    B = len(record_len)
    C, H, W = 64, 16, 16
    x = jax.random.normal(kx, (N, C, H, W), jnp.float32)
    # Confidence maps at the level-0 feature resolution (no interpolation branch).
    H0 = (H + 2 - 3) // 2 + 1
    W0 = (W + 2 - 3) // 2 + 1
    fuse_psm_single = jax.random.normal(kc, (N, 2, H0, W0), jnp.float32)
    pairwise_t_matrix = jnp.zeros((B, 2, 2, 4, 4), jnp.float32)

    out, rate = fast2comm_forward(params, args, x, fuse_psm_single, record_len,
                                  pairwise_t_matrix)
    jax.block_until_ready(out)
    jax.block_until_ready(rate)
    assert out.shape == (B, 384, H0, W0)
    print("KERNEL_OK")
</pallas_src>

<mosaic_0001>
module attributes {stable_mosaic.version = 11 : i64} {
  func.func @_tapconv_kernel(%arg0: i32, %arg1: memref<1x256x128xbf16, #tpu.memory_space<vmem>>, %arg2: memref<4x64x256xbf16, #tpu.memory_space<vmem>>, %arg3: memref<1x128xf32, #tpu.memory_space<vmem>>, %arg4: memref<64x1xf32, #tpu.memory_space<vmem>>, %arg5: memref<64x1xf32, #tpu.memory_space<vmem>>, %arg6: memref<1x64x128xbf16, #tpu.memory_space<vmem>>) attributes {dimension_semantics = [#tpu.dimension_semantics<parallel>], iteration_bounds = array<i64: 4>, scalar_prefetch = 0 : i64, scratch_operands = 0 : i64, tpu.core_type = #tpu.core_type<tc>, window_params = [{transform_indices = @transform_0, window_bounds = array<i64: 1, 256, 128>}, {pipeline_mode = #tpu.pipeline_mode<synchronous>, transform_indices = @transform_1, window_bounds = array<i64: 4, 64, 256>}, {pipeline_mode = #tpu.pipeline_mode<synchronous>, transform_indices = @transform_2, window_bounds = array<i64: 1, 128>}, {pipeline_mode = #tpu.pipeline_mode<synchronous>, transform_indices = @transform_3, window_bounds = array<i64: 64, 1>}, {pipeline_mode = #tpu.pipeline_mode<synchronous>, transform_indices = @transform_4, window_bounds = array<i64: 64, 1>}, {transform_indices = @transform_5, window_bounds = array<i64: 1, 64, 128>}]} {
    %c0 = arith.constant 0 : index
    %c0_0 = arith.constant 0 : index
    %c0_1 = arith.constant 0 : index
    %0 = vector.load %arg1[%c0, %c0_0, %c0_1] : memref<1x256x128xbf16, #tpu.memory_space<vmem>>, vector<1x256x128xbf16>
    %1 = vector.shape_cast %0 : vector<1x256x128xbf16> to vector<256x128xbf16>
    %c0_2 = arith.constant 0 : index
    %c0_3 = arith.constant 0 : index
    %c0_4 = arith.constant 0 : index
    %2 = vector.load %arg2[%c0_2, %c0_3, %c0_4] : memref<4x64x256xbf16, #tpu.memory_space<vmem>>, vector<1x64x256xbf16>
    %3 = vector.shape_cast %2 : vector<1x64x256xbf16> to vector<64x256xbf16>
    %cst = arith.constant dense<0.000000e+00> : vector<64x128xf32>
    %4 = tpu.matmul %3, %1, %cst {dimension_numbers = #tpu.dot_dimension_numbers<[1], [0], [0], [1], [0, 0, 1, 1], [], []>} : vector<64x256xbf16>, vector<256x128xbf16>, vector<64x128xf32> -> vector<64x128xf32>
    %c1 = arith.constant 1 : index
    %c0_5 = arith.constant 0 : index
    %c0_6 = arith.constant 0 : index
    %5 = vector.load %arg2[%c1, %c0_5, %c0_6] : memref<4x64x256xbf16, #tpu.memory_space<vmem>>, vector<1x64x256xbf16>
    %6 = vector.shape_cast %5 : vector<1x64x256xbf16> to vector<64x256xbf16>
    %cst_7 = arith.constant dense<0.000000e+00> : vector<64x128xf32>
    %7 = tpu.matmul %6, %1, %cst_7 {dimension_numbers = #tpu.dot_dimension_numbers<[1], [0], [0], [1], [0, 0, 1, 1], [], []>} : vector<64x256xbf16>, vector<256x128xbf16>, vector<64x128xf32> -> vector<64x128xf32>
    %c127_i32 = arith.constant 127 : i32
    %8 = tpu.dynamic_rotate %7 by %c127_i32 dim 1 : vector<64x128xf32>, i32 -> vector<64x128xf32>
    %9 = arith.addf %4, %8 : vector<64x128xf32>
    %c2 = arith.constant 2 : index
    %c0_8 = arith.constant 0 : index
    %c0_9 = arith.constant 0 : index
    %10 = vector.load %arg2[%c2, %c0_8, %c0_9] : memref<4x64x256xbf16, #tpu.memory_space<vmem>>, vector<1x64x256xbf16>
    %11 = vector.shape_cast %10 : vector<1x64x256xbf16> to vector<64x256xbf16>
    %cst_10 = arith.constant dense<0.000000e+00> : vector<64x128xf32>
    %12 = tpu.matmul %11, %1, %cst_10 {dimension_numbers = #tpu.dot_dimension_numbers<[1], [0], [0], [1], [0, 0, 1, 1], [], []>} : vector<64x256xbf16>, vector<256x128xbf16>, vector<64x128xf32> -> vector<64x128xf32>
    %c119_i32 = arith.constant 119 : i32
    %13 = tpu.dynamic_rotate %12 by %c119_i32 dim 1 : vector<64x128xf32>, i32 -> vector<64x128xf32>
    %14 = arith.addf %9, %13 : vector<64x128xf32>
    %c3 = arith.constant 3 : index
    %c0_11 = arith.constant 0 : index
    %c0_12 = arith.constant 0 : index
    %15 = vector.load %arg2[%c3, %c0_11, %c0_12] : memref<4x64x256xbf16, #tpu.memory_space<vmem>>, vector<1x64x256xbf16>
    %16 = vector.shape_cast %15 : vector<1x64x256xbf16> to vector<64x256xbf16>
    %cst_13 = arith.constant dense<0.000000e+00> : vector<64x128xf32>
    %17 = tpu.matmul %16, %1, %cst_13 {dimension_numbers = #tpu.dot_dimension_numbers<[1], [0], [0], [1], [0, 0, 1, 1], [], []>} : vector<64x256xbf16>, vector<256x128xbf16>, vector<64x128xf32> -> vector<64x128xf32>
    %c118_i32 = arith.constant 118 : i32
    %18 = tpu.dynamic_rotate %17 by %c118_i32 dim 1 : vector<64x128xf32>, i32 -> vector<64x128xf32>
    %19 = arith.addf %14, %18 : vector<64x128xf32>
    %c0_14 = arith.constant 0 : index
    %c0_15 = arith.constant 0 : index
    %20 = vector.load %arg4[%c0_14, %c0_15] : memref<64x1xf32, #tpu.memory_space<vmem>>, vector<64x1xf32>
    %21 = vector.broadcast %20 : vector<64x1xf32> to vector<64x128xf32>
    %22 = arith.mulf %19, %21 : vector<64x128xf32>
    %c0_16 = arith.constant 0 : index
    %c0_17 = arith.constant 0 : index
    %23 = vector.load %arg5[%c0_16, %c0_17] : memref<64x1xf32, #tpu.memory_space<vmem>>, vector<64x1xf32>
    %24 = vector.broadcast %23 : vector<64x1xf32> to vector<64x128xf32>
    %25 = arith.addf %22, %24 : vector<64x128xf32>
    %cst_18 = arith.constant 0.000000e+00 : f32
    %26 = vector.broadcast %cst_18 : f32 to vector<64x128xf32>
    %27 = arith.maximumf %25, %26 : vector<64x128xf32>
    %c0_19 = arith.constant 0 : index
    %c0_20 = arith.constant 0 : index
    %28 = vector.load %arg3[%c0_19, %c0_20] : memref<1x128xf32, #tpu.memory_space<vmem>>, vector<1x128xf32>
    %29 = vector.broadcast %28 : vector<1x128xf32> to vector<64x128xf32>
    %30 = arith.mulf %27, %29 : vector<64x128xf32>
    %31 = arith.truncf %30 : vector<64x128xf32> to vector<64x128xbf16>
    %c0_21 = arith.constant 0 : index
    %c0_22 = arith.constant 0 : index
    %c0_23 = arith.constant 0 : index
    %32 = vector.load %arg6[%c0_21, %c0_22, %c0_23] : memref<1x64x128xbf16, #tpu.memory_space<vmem>>, vector<1x64x128xbf16>
    %33 = vector.shape_cast %32 : vector<1x64x128xbf16> to vector<64x128xbf16>
    %34 = vector.shape_cast %31 : vector<64x128xbf16> to vector<1x64x128xbf16>
    tpu.vector_store %arg6[%c0_21, %c0_22, %c0_23], %34 {strides = array<i32>} : memref<1x64x128xbf16, #tpu.memory_space<vmem>>, vector<1x64x128xbf16>,
    return
  }
  func.func @transform_0(%arg0: i32) -> (i32, i32, i32) {
    %c0_i32 = arith.constant 0 : i32
    %c0_i32_0 = arith.constant 0 : i32
    %c0_i32_1 = arith.constant 0 : i32
    return %arg0, %c0_i32, %c0_i32_0 : i32, i32, i32
  }
  func.func @transform_1(%arg0: i32) -> (i32, i32, i32) {
    %c0_i32 = arith.constant 0 : i32
    %c0_i32_0 = arith.constant 0 : i32
    %c0_i32_1 = arith.constant 0 : i32
    %c0_i32_2 = arith.constant 0 : i32
    return %c0_i32, %c0_i32_0, %c0_i32_1 : i32, i32, i32
  }
  func.func @transform_2(%arg0: i32) -> (i32, i32) {
    %c0_i32 = arith.constant 0 : i32
    %c0_i32_0 = arith.constant 0 : i32
    %c0_i32_1 = arith.constant 0 : i32
    return %c0_i32, %c0_i32_0 : i32, i32
  }
  func.func @transform_3(%arg0: i32) -> (i32, i32) {
    %c0_i32 = arith.constant 0 : i32
    %c0_i32_0 = arith.constant 0 : i32
    %c0_i32_1 = arith.constant 0 : i32
    return %c0_i32, %c0_i32_0 : i32, i32
  }
  func.func @transform_4(%arg0: i32) -> (i32, i32) {
    %c0_i32 = arith.constant 0 : i32
    %c0_i32_0 = arith.constant 0 : i32
    %c0_i32_1 = arith.constant 0 : i32
    return %c0_i32, %c0_i32_0 : i32, i32
  }
  func.func @transform_5(%arg0: i32) -> (i32, i32, i32) {
    %c0_i32 = arith.constant 0 : i32
    %c0_i32_0 = arith.constant 0 : i32
    %c0_i32_1 = arith.constant 0 : i32
    return %arg0, %c0_i32, %c0_i32_0 : i32, i32, i32
  }
}

</mosaic_0001>

<bundles_post_ra>
// kernel: tpu_custom_call.1
= control target key start
LH: loop header
LB: loop body
LE: loop exit
PB: predicated region body
PF: predicated region fallthrough
CT: control target
= control target key end

     0   :  { %10 = vsyncpa [#allocation3], 0  ;;  %s2169_s0 = inlined_call_operand.hbm [shape: bf16[4,256,128], index: 0, kind: input, shape index: {}]   ;;  %s2170_s1 = inlined_call_operand.hbm [shape: bf16[4,64,256], index: 1, kind: input, shape index: {}]   ;;  %s2171_s2 = inlined_call_operand.vmem [shape: f32[1,128], index: 2, kind: input, shape index: {}]   ;;  %s2172_s3 = inlined_call_operand.vmem [shape: f32[64,1], index: 3, kind: input, shape index: {}]   ;;  %s2173_s4 = inlined_call_operand.vmem [shape: f32[64,1], index: 4, kind: input, shape index: {}]   ;;  %s2174_s5 = inlined_call_operand.hbm [shape: bf16[4,64,128], index: 5, kind: output, shape index: {}]  }
   0x1   :  { %12 = vsyncpa [#allocation3 + $0x1], 0 }
   0x2   :  { %13 = vsyncpa [#allocation6], 0 }
   0x3   :  { %14 = vsyncpa [#allocation4], 0 }
   0x4   :  { %16 = vsyncpa [#allocation4 + $0x1], 0  ;;  %s1750_s18 = smov 0   ;;  %s1752_s19 = smov 0  }
   0x5   :  { %s1754_s20 = smov 0   ;;  %s1756_s21 = smov 0  }
   0x6 LB: > { %s1771_s22 = sadd.s32 4294967295, %s1705_s21   ;;  %s1178_s23 = sadd.s32 4294967294, %s1705_s21   ;;  %s1705_s21 = sphi %s1756_s21, %s2193_s21   ;;  %s1701_s20 = sphi %s1754_s20, %s2192_s20   ;;  %s1697_s19 = sphi %s1752_s19, %s2191_s19   ;;  %s1693_s18 = sphi %s1750_s18, %s2190_s18  }
   0x7   : > { %p42_p0 = scmp.ne.s32.totalorder %s1697_s19, %s1693_s18  ;;  %p2175_p1 = scmp.eq.s32.totalorder %s1771_s22, 0 }
   0x8   : > { %p156_p3 = scmp.eq.s32.totalorder %s1178_s23, 3  ;;  %p1179_p5 = scmp.ge.s32.totalorder %s1705_s21, 1 }
   0x9   : > { %p1780_p4 = por %p2175_p1, %p42_p0  ;;  %p163_p7 = scmp.lt.s32.totalorder %s1705_s21, 5 }
   0xa   : > { %p1785_p6 = por %p156_p3, %p42_p0  ;;  %s1707_s27 = smov [#allocation5]  }
   0xb   : > { %s2178_s24 = scalar_select %p1780_p4, 1, 0 }
   0xc   : > { %s2179_s25 = scalar_select %p1785_p6, 1, 0 }
   0xd   : > { %p1790_p8 = pnand %p1179_p5, %p163_p7  ;;  %s175_s28 = sshll.u32 %s1707_s27, 4  ;;  %s176_s28 = int_to_ptr.vmem [resolvable:$true] %s175_s28 }
   0xe   : > { %s1803_s30 = sadd.s32 1, %s1705_s21   ;;  %s29_s6 = sadd.s32 1, %s1701_s20 }
   0xf   : > { %s2180_s26 = scalar_select %p1790_p8, 1, 0 }
  0x10   : > { %p1452_p9 = pneg %p1790_p8  ;;  %s26_s7 = ssub.s32 %s1705_s21, %s1803_s30 }
  0x11   : > { %s1577_s10 = scalar_lea.hbm %s2170_s1, 4096 }
  0x12   : > { %p1798_p10 = pnand %p1452_p9, %p2175_p1  ;;  %p1578_p11 = scmp.ne.s32.totalorder %s2170_s1, %s1577_s10 }
  0x13   : > { %p1584_p3 = scmp.lt.u32.totalorder %s1577_s10, %s2170_s1 }
  0x14   : > { %p1579_p12 = pneg %p1798_p10 }
  0x16   : > { %p1580_p13 = pnand %p1579_p12, %p1578_p11 }
  0x18   : > { %p1581_p0 = pneg %p1580_p13 }
  0x1a   : > { %p1586_p5 = pnand %p1584_p3, %p1581_p0 }
  0x1c   : > { %1589 = shalt.err (!%p1586_p5)
}
  0x1d   : > { %s1590_s15 = scalar_lea.vmem %s176_s28, 4096  ;;  %p1598_p2 = scmp.lt.s32.totalorder %s176_s28, %s176_s28 }
  0x1e   : > { %p1591_p7 = scmp.ne.s32.totalorder %s176_s28, %s1590_s15  ;;  %p1599_p6 = scmp.lt.s32.totalorder %s1590_s15, %s1590_s15 }
  0x20   : > { %p1593_p9 = pnand %p1591_p7, %p1579_p12  ;;  %p1600_p4 = por %p1599_p6, %p1598_p2 }
  0x22   : > { %p1594_p1 = pneg %p1593_p9 }
  0x24   : > { %p1601_p8 = pnand %p1600_p4, %p1594_p1 }
  0x26   : > { %1604 = shalt.err (!%p1601_p8)
}
  0x27   : > { %s1708_s16 = smov 128   ;;  %s1709_s17 = smov 8  }
  0x28   : > { %1455 = dma.hbm_to_vmem [thread:$0]  (!%p1798_p10), %s2170_s1, 4096, %s176_s28, [#allocation6], %s1708_s16, %s1708_s16, %s1709_s17  }
  0x29   : > { %p27_p11 = scmp.eq.s32.totalorder %s26_s7, 0  ;;  %p36_p2 = scmp.ne.s32.totalorder %s1701_s20, %s1697_s19 }
  0x2a   : > { %p37_p1 = scmp.eq.s32.totalorder %s1705_s21, 0  ;;  %p1465_p4 = scmp.lt.s32.totalorder %s1705_s21, 4 }
  0x2b   : > { %s1829_s8 = scalar_select %p27_p11, %s1701_s20, %s29_s6  }
  0x2c   : > { %p38_p6 = por %p37_p1, %p36_p2  ;;  %p2182_p8 = scmp.eq.s32.totalorder %s1771_s22, 3 }
  0x2d   : > { %s198_s10 = sand.u32 1, %s1701_s20   ;;  %s1251_s11 = sshll.u32 %s1705_s21, 11 }
  0x2e   : > { %p1833_p12 = por %p2182_p8, %p36_p2  ;;  %s1182_s12 = sshll.u32 %s198_s10, 7 }
  0x2f   : > { %s1842_s14 = scalar_lea.hbm %s2169_s0, %s1251_s11  ;;  %s202_s28 = scalar_lea.vmem [#allocation2], %s1182_s12 }
  0x30   : > { %s209_s6 = sshll.u32 %s202_s28, 4  ;;  %p1844_p10 = pnand %p1465_p4, %p38_p6  ;;  %s1848_s6 = int_to_ptr.vmem [resolvable:$true] %s209_s6 }
  0x31   : > { %s1850_s15 = scalar_lea.sflag [#allocation3], %s198_s10  ;;  %s1605_s16 = scalar_lea.hbm %s1842_s14, 2048 }
  0x32   : > { %p1606_p13 = scmp.ne.s32.totalorder %s1842_s14, %s1605_s16  ;;  %p1607_p0 = pneg %p1844_p10 }
  0x33   : > { %s1610_s27 = scalar_lea.hbm %s2169_s0, 8192  ;;  %p1611_p7 = scmp.lt.u32.totalorder %s1842_s14, %s2169_s0 }
  0x34   : > { %p1608_p3 = pnand %p1607_p0, %p1606_p13  ;;  %p1612_p9 = scmp.lt.u32.totalorder %s1610_s27, %s1605_s16 }
  0x35   : > { %p1614_p2 = scmp.lt.u32.totalorder %s1605_s16, %s1842_s14 }
  0x36   : > { %p1609_p5 = pneg %p1608_p3  ;;  %p1613_p11 = por %p1612_p9, %p1611_p7 }
  0x38   : > { %p1615_p1 = por %p1614_p2, %p1613_p11 }
  0x3a   : > { %p1616_p4 = pnand %p1615_p1, %p1609_p5 }
  0x3c   : > { %1619 = shalt.err (!%p1616_p4)
}
  0x3d   : > { %s1620_s10 = scalar_lea.vmem %s1848_s6, 2048  ;;  %s1710_s29 = smov [#allocation2]  }
  0x3e   : > { %p1621_p6 = scmp.ne.s32.totalorder %s1848_s6, %s1620_s10  ;;  %s1625_s13 = sshll.u32 %s1710_s29, 4  ;;  %s1626_s13 = int_to_ptr.vmem [resolvable:$false] %s1625_s13 }
  0x3f   : > { %s1627_s28 = scalar_lea.vmem %s1626_s13, 4096  ;;  %p1628_p3 = scmp.lt.s32.totalorder %s1848_s6, %s1626_s13 }
  0x40   : > { %p1623_p8 = pnand %p1621_p6, %p1607_p0  ;;  %p1629_p7 = scmp.lt.s32.totalorder %s1627_s28, %s1620_s10 }
  0x42   : > { %p1624_p13 = pneg %p1623_p8  ;;  %p1630_p9 = por %p1629_p7, %p1628_p3 }
  0x44   : > { %p1631_p11 = pnand %p1630_p9, %p1624_p13 }
  0x46   : > { %1634 = shalt.err (!%p1631_p11)
}
  0x47   : > { %s1711_s16 = smov 64   ;;  %s1712_s17 = smov 4  }
  0x48   : > { %1459 = dma.hbm_to_vmem [thread:$0]  (!%p1844_p10), %s1842_s14, 2048, %s1848_s6, %s1850_s15, %s1711_s16, %s1711_s16, %s1712_s17  }
  0x49   : > { %p2185_p0 = scmp.ne.s32.totalorder %s2180_s26, 0 }
  0x4a   : > { %s1881_s23 = sand.u32 (!%p2185_p0), 1, %s1697_s19   ;;  %p2186_p5 = scmp.ne.s32.totalorder (!%p2185_p0), %s2178_s24, 0 }
  0x4b   : > { %221 = sbr.rel (%p2185_p0) target bundleno = 539 (0x21b), region = 40  ;;  %s1186_s27 = sshll.u32 (!%p2185_p0), %s1881_s23, 7 }
  0x4c   : > { %s224_s11 = scalar_lea.sflag (!%p2185_p0), [#allocation3], %s1881_s23  ;;  %s1885_s12 = scalar_lea.vmem (!%p2185_p0), [#allocation2], %s1186_s27 }
  0x52   : > { %1680 = dma.done.wait (%p2186_p5), %s224_s11, 2048  }
  0x53   : > { %1682 = vsyncadd (%p2186_p5), %s224_s11, 4294965248  ;;  %p2187_p10 = scmp.eq.s32.totalorder %s1771_s22, 0 }
  0x55   : > { %1684 = dma.done.wait (%p2187_p10), [#allocation6], 4096   ;;  %p2188_p2 = pmov %p2187_p10 }
  0x56   : > { %v1713_v0 = vmov 0   ;;  %v1513_v1 = vld [vmem:[%s1885_s12 + $0x40] sm:$0xff]   ;;  %v1515_v3 = vld [vmem:[%s1885_s12 + $0x48] sm:$0xff]   ;;  %v1902_v5 = vld [vmem:[%s1885_s12 + $0x50] sm:$0xff]   ;;  %s1714_s14 = smov 127   ;;  %s1715_s6 = smov 119  }
  0x57   : > { %1686 = vsyncadd (%p2188_p2), [#allocation6], 4294963200  ;;  %1512 = vset.pattern.permute.xlu1 %v1713_v0  ;;  %1511 = vset.pattern.permute.xlu0 %v1713_v0  ;;  %v1514_v2 = vld [vmem:[%s1885_s12] sm:$0xff]   ;;  %v1899_v4 = vld [vmem:[%s1885_s12 + $0x8] sm:$0xff]   ;;  %s1716_s7 = smov 118   ;;  %s1188_s29 = sshll.u32 %s1881_s23, 5 }
  0x58   : > { %1284 = vmatprep.subr.bf16.mxu0 %v1513_v1  ;;  %1324 = vmatprep.subr.bf16.mxu1 %v1513_v1  ;;  %v1907_v6 = vld [vmem:[%s1885_s12 + $0x10] sm:$0xff]   ;;  %v1912_v7 = vld [vmem:[%s1885_s12 + $0x58] sm:$0xff]   ;;  %v1922_v9 = vld [vmem:[%s1885_s12 + $0x60] sm:$0xff]   ;;  %s2102_s13 = scalar_lea.vmem [#allocation7], %s1188_s29  ;;  %s1260_s28 = sshll.u32 %s1771_s22, 9 }
  0x59   : > { %1285 = vmatpush3.bf16.msra.mxu0 %v1514_v2  ;;  %1325 = vmatpush3.bf16.msra.mxu1 %v1514_v2  ;;  %v1917_v8 = vld [vmem:[%s1885_s12 + $0x18] sm:$0xff]   ;;  %v1927_v10 = vld [vmem:[%s1885_s12 + $0x20] sm:$0xff]   ;;  %v1932_v11 = vld [vmem:[%s1885_s12 + $0x68] sm:$0xff]   ;;  %s1095_s16 = sshll.u32 %s2102_s13, 4  ;;  %s2123_s11 = scalar_lea.hbm %s2174_s5, %s1260_s28  ;;  %s2125_s16 = int_to_ptr.vmem [resolvable:$true] %s1095_s16 }
  0x5a   : > { %1286 = vmatprep.subr.bf16.mxu0 %v1515_v3  ;;  %1326 = vmatprep.subr.bf16.mxu1 %v1515_v3  ;;  %v1531_v12 = vld [vmem:[#allocation5 + $0x44] ss:$8 sps:$4 sm:$0xff]   ;;  %v1942_v15 = vld [vmem:[%s1885_s12 + $0x70] sm:$0xff]   ;;  %v1952_v17 = vld [vmem:[%s1885_s12 + $0x78] sm:$0xff]   ;;  %s1635_s24 = scalar_lea.vmem %s2125_s16, 512  ;;  %s1717_s22 = smov [#allocation7]  }
  0x5b   : > { %v1534_v13 = vld [vmem:[#allocation5 + $0x4] ss:$8 sps:$4 sm:$0xff]   ;;  %476 = vmatprep.mubr.bf16.mxu0 %v1531_v12  ;;  %v1947_v16 = vld [vmem:[%s1885_s12 + $0x30] sm:$0xff]   ;;  %v1957_v18 = vld [vmem:[%s1885_s12 + $0x38] sm:$0xff]   ;;  %p1636_p1 = scmp.ne.s32.totalorder %s2125_s16, %s1635_s24  ;;  %s1639_s26 = sshll.u32 %s1717_s22, 4  ;;  %s1640_s26 = int_to_ptr.vmem [resolvable:$false] %s1639_s26 }
  0x5c   : > { %v1937_v14 = vld [vmem:[%s1885_s12 + $0x28] sm:$0xff]   ;;  %597 = vmatprep.mubr.bf16.mxu1 %v1534_v13  ;;  %v1535_v21 = vld [vmem:[#allocation5 + $0x54] ss:$8 sps:$4 sm:$0xff]   ;;  %v906_v24 = vld [vmem:[%s2172_s3] sm:$0xff]  ;;  %s1082_s12 = scalar_lea.sflag [#allocation4], %s1881_s23  ;;  %p1642_p8 = scmp.lt.s32.totalorder %s2125_s16, %s1640_s26 }
  0x5d   : > { %1287 = vmatpush3.bf16.msra.mxu0 %v1899_v4  ;;  %1327 = vmatpush3.bf16.msra.mxu1 %v1899_v4  ;;  %v1529_v19 = vld [vmem:[#allocation5 + $0x40] ss:$8 sps:$4 sm:$0xff]   ;;  %v1537_v22 = vld [vmem:[#allocation5 + $0x14] ss:$8 sps:$4 sm:$0xff]   ;;  %v1539_v25 = vld [vmem:[#allocation5 + $0x50] ss:$8 sps:$4 sm:$0xff]   ;;  %p1637_p4 = pnand %p1636_p1, %p1833_p12 }
  0x5e   : > { %1288 = vmatprep.subr.bf16.mxu0 %v1902_v5  ;;  %1328 = vmatprep.subr.bf16.mxu1 %v1902_v5  ;;  %v1532_v20 = vld [vmem:[#allocation5] ss:$8 sps:$4 sm:$0xff]   ;;  %v1540_v26 = vld [vmem:[#allocation5 + $0x10] ss:$8 sps:$4 sm:$0xff]   ;;  %v1541_v27 = vld [vmem:[#allocation5 + $0x64] ss:$8 sps:$4 sm:$0xff]  }
  0x5f   : > { %v907_v23 = vld [vmem:[%s2172_s3 + $0x8] sm:$0xff]  ;;  %916 = vperm.xlu0 %1511, %v906_v24   ;;  %v908_v29 = vld [vmem:[%s2172_s3 + $0x10] sm:$0xff]  ;;  %v909_v30 = vld [vmem:[%s2172_s3 + $0x18] sm:$0xff]  ;;  %p1638_p6 = pneg %p1637_p4 }
  0x60   : > { %921 = vperm.xlu1 %1512, %v907_v23   ;;  %v1543_v28 = vld [vmem:[#allocation5 + $0x24] ss:$8 sps:$4 sm:$0xff]   ;;  %v1545_v31 = vld [vmem:[#allocation5 + $0x60] ss:$8 sps:$4 sm:$0xff]   ;;  %v1547_v33 = vld [vmem:[#allocation5 + $0x74] ss:$8 sps:$4 sm:$0xff]  }
  0x61   : > { %1289 = vmatpush3.bf16.msra.mxu0 %v1907_v6  ;;  %1329 = vmatpush3.bf16.msra.mxu1 %v1907_v6  ;;  %v1546_v32 = vld [vmem:[#allocation5 + $0x20] ss:$8 sps:$4 sm:$0xff]   ;;  %v1549_v34 = vld [vmem:[#allocation5 + $0x34] ss:$8 sps:$4 sm:$0xff]   ;;  %v1551_v37 = vld [vmem:[#allocation5 + $0x70] ss:$8 sps:$4 sm:$0xff]  }
  0x62   : > { %1290 = vmatprep.subr.bf16.mxu0 %v1912_v7  ;;  %1330 = vmatprep.subr.bf16.mxu1 %v1912_v7  ;;  %v910_v35 = vld [vmem:[%s2172_s3 + $0x20] sm:$0xff]  ;;  %v911_v36 = vld [vmem:[%s2172_s3 + $0x28] sm:$0xff]  ;;  %v1552_v38 = vld [vmem:[#allocation5 + $0x30] ss:$8 sps:$4 sm:$0xff]  }
  0x63   : > { %931 = vperm.xlu0 %1511, %v909_v30   ;;  %v1555_v39 = vld [vmem:[#allocation5 + $0x84] ss:$8 sps:$4 sm:$0xff]   ;;  %v912_v41 = vld [vmem:[%s2172_s3 + $0x30] sm:$0xff]  ;;  %v913_v42 = vld [vmem:[%s2172_s3 + $0x38] sm:$0xff] }
  0x64   : > { %926 = vperm.xlu1 %1512, %v908_v29   ;;  %v1558_v40 = vld [vmem:[#allocation5 + $0xc4] ss:$8 sps:$4 sm:$0xff]   ;;  %v1553_v43 = vld [vmem:[#allocation5 + $0x80] ss:$8 sps:$4 sm:$0xff]   ;;  %v1559_v45 = vld [vmem:[#allocation5 + $0x94] ss:$8 sps:$4 sm:$0xff]  }
  0x65   : > { %1291 = vmatpush3.bf16.msra.mxu0 %v1917_v8  ;;  %1331 = vmatpush3.bf16.msra.mxu1 %v1917_v8  ;;  %v1556_v44 = vld [vmem:[#allocation5 + $0xc0] ss:$8 sps:$4 sm:$0xff]   ;;  %v1561_v46 = vld [vmem:[#allocation5 + $0xd4] ss:$8 sps:$4 sm:$0xff]   ;;  %v1563_v51 = vld [vmem:[#allocation5 + $0x90] ss:$8 sps:$4 sm:$0xff]  }
  0x66   : > { %1292 = vmatprep.subr.bf16.mxu0 %v1922_v9  ;;  %1332 = vmatprep.subr.bf16.mxu1 %v1922_v9  ;;  %v962_v47 = vld [vmem:[%s2173_s4] sm:$0xff]  ;;  %v963_v48 = vld [vmem:[%s2173_s4 + $0x8] sm:$0xff]  ;;  %v964_v49 = vld [vmem:[%s2173_s4 + $0x10] sm:$0xff] }
  0x67   : > { %941 = vperm.xlu0 %1511, %v911_v36   ;;  %v965_v50 = vld [vmem:[%s2173_s4 + $0x18] sm:$0xff]  ;;  %v1565_v53 = vld [vmem:[#allocation5 + $0xa4] ss:$8 sps:$4 sm:$0xff]   ;;  %v968_v57 = vld [vmem:[%s2173_s4 + $0x30] sm:$0xff] }
  0x68   : > { %936 = vperm.xlu1 %1512, %v910_v35   ;;  %v1564_v52 = vld [vmem:[#allocation5 + $0xd0] ss:$8 sps:$4 sm:$0xff]   ;;  %v1567_v54 = vld [vmem:[#allocation5 + $0xe4] ss:$8 sps:$4 sm:$0xff]   ;;  %v1569_v59 = vld [vmem:[#allocation5 + $0xa0] ss:$8 sps:$4 sm:$0xff]  }
  0x69   : > { %1293 = vmatpush3.bf16.msra.mxu0 %v1927_v10  ;;  %1333 = vmatpush3.bf16.msra.mxu1 %v1927_v10  ;;  %v966_v55 = vld [vmem:[%s2173_s4 + $0x20] sm:$0xff]  ;;  %v967_v56 = vld [vmem:[%s2173_s4 + $0x28] sm:$0xff]  ;;  %v969_v58 = vld [vmem:[%s2173_s4 + $0x38] sm:$0xff] }
  0x6a   : > { %1294 = vmatprep.subr.bf16.mxu0 %v1932_v11  ;;  %1334 = vmatprep.subr.bf16.mxu1 %v1932_v11  ;;  %v1570_v60 = vld [vmem:[#allocation5 + $0xe0] ss:$8 sps:$4 sm:$0xff]   ;;  %v1571_v61 = vld [vmem:[#allocation5 + $0xb4] ss:$8 sps:$4 sm:$0xff]   ;;  %v1573_v63 = vld [vmem:[#allocation5 + $0xb0] ss:$8 sps:$4 sm:$0xff]  }
  0x6b   : > { %951 = vperm.xlu0 %1511, %v913_v42   ;;  %v1574_v62 = vld [vmem:[#allocation5 + $0xf4] ss:$8 sps:$4 sm:$0xff]   ;;  %v1576_v0 = vld [vmem:[#allocation5 + $0xf0] ss:$8 sps:$4 sm:$0xff]  }
  0x6c   : > { %946 = vperm.xlu1 %1512, %v912_v41  }
  0x6d   : > { %1295 = vmatpush3.bf16.msra.mxu0 %v1937_v14  ;;  %1335 = vmatpush3.bf16.msra.mxu1 %v1937_v14 }
  0x6e   : > { %1296 = vmatprep.subr.bf16.mxu0 %v1942_v15  ;;  %1336 = vmatprep.subr.bf16.mxu1 %v1942_v15 }
  0x6f   : > { %977 = vperm.xlu0 %1511, %v963_v48  }
  0x70   : > { %972 = vperm.xlu1 %1512, %v962_v47  }
  0x71   : > { %1297 = vmatpush3.bf16.msra.mxu0 %v1947_v16  ;;  %1337 = vmatpush3.bf16.msra.mxu1 %v1947_v16 }
  0x72   : > { %1298 = vmatprep.subr.bf16.mxu0 %v1952_v17  ;;  %1338 = vmatprep.subr.bf16.mxu1 %v1952_v17 }
  0x73   : > { %987 = vperm.xlu0 %1511, %v965_v50  }
  0x74   : > { %982 = vperm.xlu1 %1512, %v964_v49  }
  0x75   : > { %1299 = vmatpush3.bf16.msra.mxu0 %v1957_v18  ;;  %1339 = vmatpush3.bf16.msra.mxu1 %v1957_v18 }
  0x76   : > { %1364 = vmatprep.subr.bf16.mxu0 %v1513_v1  ;;  %1404 = vmatprep.subr.bf16.mxu1 %v1513_v1 }
  0x77   : > { %997 = vperm.xlu0 %1511, %v967_v56  }
  0x78   : > { %477 = vmatmul.mubr.bf16.vlgmr.msra.gmra.mrb[0].mxu0 %v1529_v19  ;;  %598 = vmatmul.mubr.bf16.vlgmr.msra.gmra.mrb[0].mxu1 %v1532_v20 }
  0x79   : > { %1365 = vmatpush3.bf16.msra.mxu0 %v1514_v2  ;;  %1405 = vmatpush3.bf16.msra.mxu1 %v1514_v2 }
  0x7a   : > { %1366 = vmatprep.subr.bf16.mxu0 %v1515_v3  ;;  %1406 = vmatprep.subr.bf16.mxu1 %v1515_v3 }
  0x7b   : > { %484 = vmatprep.mubr.bf16.mxu0 %v1535_v21  ;;  %605 = vmatprep.mubr.bf16.mxu1 %v1537_v22 }
  0x7c   : > { %992 = vperm.xlu1 %1512, %v966_v55   ;;  %1007 = vperm.xlu0 %1511, %v969_v58  }
  0x7d   : > { %1367 = vmatpush3.bf16.msra.mxu0 %v1899_v4  ;;  %1407 = vmatpush3.bf16.msra.mxu1 %v1899_v4 }
  0x7e   : > { %1368 = vmatprep.subr.bf16.mxu0 %v1902_v5  ;;  %1408 = vmatprep.subr.bf16.mxu1 %v1902_v5 }
  0x80   : > { %485 = vmatmul.mubr.bf16.gmra.mrb[4].mxu0 %v1539_v25  ;;  %606 = vmatmul.mubr.bf16.gmra.mrb[4].mxu1 %v1540_v26 }
  0x81   : > { %1369 = vmatpush3.bf16.msra.mxu0 %v1907_v6  ;;  %1409 = vmatpush3.bf16.msra.mxu1 %v1907_v6 }
  0x82   : > { %1370 = vmatprep.subr.bf16.mxu0 %v1912_v7  ;;  %1410 = vmatprep.subr.bf16.mxu1 %v1912_v7 }
  0x83   : > { %492 = vmatprep.mubr.bf16.mxu0 %v1541_v27  ;;  %613 = vmatprep.mubr.bf16.mxu1 %v1543_v28 }
  0x84   : > { %1002 = vperm.xlu1 %1512, %v968_v57  }
  0x85   : > { %1371 = vmatpush3.bf16.msra.mxu0 %v1917_v8  ;;  %1411 = vmatpush3.bf16.msra.mxu1 %v1917_v8 }
  0x86   : > { %1372 = vmatprep.subr.bf16.mxu0 %v1922_v9  ;;  %1412 = vmatprep.subr.bf16.mxu1 %v1922_v9 }
  0x88   : > { %493 = vmatmul.mubr.bf16.gmra.mrb[8].mxu0 %v1545_v31  ;;  %614 = vmatmul.mubr.bf16.gmra.mrb[8].mxu1 %v1546_v32 }
  0x89   : > { %1373 = vmatpush3.bf16.msra.mxu0 %v1927_v10  ;;  %1413 = vmatpush3.bf16.msra.mxu1 %v1927_v10 }
  0x8a   : > { %1374 = vmatprep.subr.bf16.mxu0 %v1932_v11  ;;  %1414 = vmatprep.subr.bf16.mxu1 %v1932_v11 }
  0x8b   : > { %500 = vmatprep.mubr.bf16.mxu0 %v1547_v33  ;;  %621 = vmatprep.mubr.bf16.mxu1 %v1549_v34 }
  0x8d   : > { %1375 = vmatpush3.bf16.msra.mxu0 %v1937_v14  ;;  %1415 = vmatpush3.bf16.msra.mxu1 %v1937_v14 }
  0x8e   : > { %1376 = vmatprep.subr.bf16.mxu0 %v1942_v15  ;;  %1416 = vmatprep.subr.bf16.mxu1 %v1942_v15 }
  0x90   : > { %501 = vmatmul.mubr.bf16.gmra.mrb[12].mxu0 %v1551_v37  ;;  %622 = vmatmul.mubr.bf16.gmra.mrb[12].mxu1 %v1552_v38 }
  0x91   : > { %1377 = vmatpush3.bf16.msra.mxu0 %v1947_v16  ;;  %1417 = vmatpush3.bf16.msra.mxu1 %v1947_v16 }
  0x92   : > { %1378 = vmatprep.subr.bf16.mxu0 %v1952_v17  ;;  %1418 = vmatprep.subr.bf16.mxu1 %v1952_v17 }
  0x93   : > { %711 = vmatprep.mubr.bf16.mxu0 %v1555_v39  ;;  %849 = vmatprep.mubr.bf16.mxu1 %v1558_v40 }
  0x95   : > { %1379 = vmatpush3.bf16.msra.mxu0 %v1957_v18  ;;  %1419 = vmatpush3.bf16.msra.mxu1 %v1957_v18 }
  0x98   : > { %712 = vmatmul.mubr.bf16.vlgmr.msra.gmra.mrb[16].mxu0 %v1553_v43  ;;  %850 = vmatmul.mubr.bf16.vlgmr.msra.gmra.mrb[16].mxu1 %v1556_v44 }
  0x99   : > { %719 = vmatprep.mubr.bf16.mxu0 %v1559_v45  ;;  %857 = vmatprep.mubr.bf16.mxu1 %v1561_v46 }
  0xa0   : > { %720 = vmatmul.mubr.bf16.gmra.mrb[20].mxu0 %v1563_v51  ;;  %858 = vmatmul.mubr.bf16.gmra.mrb[20].mxu1 %v1564_v52 }
  0xa1   : > { %727 = vmatprep.mubr.bf16.mxu0 %v1565_v53  ;;  %865 = vmatprep.mubr.bf16.mxu1 %v1567_v54 }
  0xa8   : > { %728 = vmatmul.mubr.bf16.gmra.mrb[24].mxu0 %v1569_v59  ;;  %866 = vmatmul.mubr.bf16.gmra.mrb[24].mxu1 %v1570_v60 }
  0xa9   : > { %735 = vmatprep.mubr.bf16.mxu0 %v1571_v61  ;;  %873 = vmatprep.mubr.bf16.mxu1 %v1574_v62 }
  0xb0   : > { %736 = vmatmul.mubr.bf16.gmra.mrb[28].mxu0 %v1573_v63  ;;  %874 = vmatmul.mubr.bf16.gmra.mrb[28].mxu1 %v1576_v0 }
 0x14b   : > { %v1300_v1 = vpop.f32.mrb[0].mxu0  ;;  %v1340_v2 = vpop.f32.mrb[0].mxu1 }
 0x14c   : > { %v1301_v3 = vpop.f32.mrb[1].mxu0  ;;  %v1341_v4 = vpop.f32.mrb[1].mxu1 }
 0x14d   : > { %v1302_v5 = vadd.f32 %v1301_v3, %v1300_v1  ;;  %v2037_v6 = vadd.f32 %v1341_v4, %v1340_v2  ;;  %v1303_v7 = vpop.f32.mrb[2].mxu0  ;;  %v1343_v8 = vpop.f32.mrb[2].mxu1 }
 0x14e   : > { %v1304_v9 = vpop.f32.mrb[3].mxu0  ;;  %v1344_v10 = vpop.f32.mrb[3].mxu1 }
 0x14f   : > { %v1305_v11 = vadd.f32 %v1304_v9, %v1303_v7  ;;  %v2039_v12 = vadd.f32 %v1344_v10, %v1343_v8  ;;  %509 = vrot.lane.b32.xlu0 %v1302_v5, %s1714_s14 }
 0x153   : > { %v1306_v13 = vpop.f32.mrb[4].mxu0  ;;  %v1346_v14 = vpop.f32.mrb[4].mxu1  ;;  %511 = vrot.lane.b32.xlu0 %v1305_v11, %s1714_s14 }
 0x154   : > { %v1307_v15 = vpop.f32.mrb[5].mxu0  ;;  %v1347_v16 = vpop.f32.mrb[5].mxu1 }
 0x155   : > { %v1308_v17 = vadd.f32 %v1307_v15, %v1306_v13  ;;  %v2043_v18 = vadd.f32 %v1347_v16, %v1346_v14  ;;  %v1309_v19 = vpop.f32.mrb[6].mxu0  ;;  %v1349_v20 = vpop.f32.mrb[6].mxu1 }
 0x156   : > { %v1310_v21 = vpop.f32.mrb[7].mxu0  ;;  %v1350_v22 = vpop.f32.mrb[7].mxu1 }
 0x157   : > { %v1311_v23 = vadd.f32 %v1310_v21, %v1309_v19  ;;  %v2045_v24 = vadd.f32 %v1350_v22, %v1349_v20  ;;  %513 = vrot.lane.b32.xlu1 %v1308_v17, %s1714_s14 }
 0x15b   : > { %v1312_v25 = vpop.f32.mrb[8].mxu0  ;;  %v1352_v26 = vpop.f32.mrb[8].mxu1  ;;  %515 = vrot.lane.b32.xlu1 %v1311_v23, %s1714_s14 }
 0x15c   : > { %v1313_v27 = vpop.f32.mrb[9].mxu0  ;;  %v1353_v28 = vpop.f32.mrb[9].mxu1 }
 0x15d   : > { %v1314_v29 = vadd.f32 %v1313_v27, %v1312_v25  ;;  %v2049_v30 = vadd.f32 %v1353_v28, %v1352_v26  ;;  %v1315_v31 = vpop.f32.mrb[10].mxu0  ;;  %v1355_v32 = vpop.f32.mrb[10].mxu1 }
 0x15e   : > { %v1316_v33 = vpop.f32.mrb[11].mxu0  ;;  %v1356_v34 = vpop.f32.mrb[11].mxu1 }
 0x15f   : > { %v1317_v35 = vadd.f32 %v1316_v33, %v1315_v31  ;;  %v2051_v36 = vadd.f32 %v1356_v34, %v1355_v32  ;;  %517 = vrot.lane.b32.xlu0 %v1314_v29, %s1714_s14 }
 0x161   : > { %519 = vrot.lane.b32.xlu1 %v1317_v35, %s1714_s14 }
 0x163   : > { %v1318_v37 = vpop.f32.mrb[12].mxu0  ;;  %v1358_v38 = vpop.f32.mrb[12].mxu1 }
 0x164   : > { %v1319_v39 = vpop.f32.mrb[13].mxu0  ;;  %v1359_v40 = vpop.f32.mrb[13].mxu1 }
 0x165   : > { %v1320_v41 = vadd.f32 %v1319_v39, %v1318_v37  ;;  %v2055_v42 = vadd.f32 %v1359_v40, %v1358_v38  ;;  %v1321_v43 = vpop.f32.mrb[14].mxu0  ;;  %v1361_v44 = vpop.f32.mrb[14].mxu1 }
 0x166   : > { %v1322_v45 = vpop.f32.mrb[15].mxu0  ;;  %v1362_v46 = vpop.f32.mrb[15].mxu1 }
 0x167   : > { %v1323_v47 = vadd.f32 %v1322_v45, %v1321_v43  ;;  %v2057_v48 = vadd.f32 %v1362_v46, %v1361_v44  ;;  %521 = vrot.lane.b32.xlu0 %v1320_v41, %s1714_s14  ;;  %v917_v39 = vpop.permute.xlu0 %916  ;;  %v922_v40 = vpop.permute.xlu1 %921 }
 0x169   : > { %523 = vrot.lane.b32.xlu1 %v1323_v47, %s1714_s14  ;;  %s1641_s14 = scalar_lea.vmem %s1640_s26, 1024 }
 0x16a   : > { %p1643_p13 = scmp.lt.s32.totalorder %s1641_s14, %s1635_s24 }
 0x16b   : > { %v1380_v49 = vpop.f32.mrb[16].mxu0  ;;  %v1420_v50 = vpop.f32.mrb[16].mxu1 }
 0x16c   : > { %v1381_v51 = vpop.f32.mrb[17].mxu0  ;;  %v1421_v52 = vpop.f32.mrb[17].mxu1  ;;  %p1644_p3 = por %p1643_p13, %p1642_p8 }
 0x16d   : > { %v1382_v53 = vadd.f32 %v1381_v51, %v1380_v49  ;;  %v1422_v54 = vadd.f32 %v1421_v52, %v1420_v50  ;;  %v1383_v55 = vpop.f32.mrb[18].mxu0  ;;  %v1423_v56 = vpop.f32.mrb[18].mxu1 }
 0x16e   : > { %v1384_v57 = vpop.f32.mrb[19].mxu0  ;;  %v1424_v58 = vpop.f32.mrb[19].mxu1  ;;  %p1645_p7 = pnand %p1644_p3, %p1638_p6 }
 0x16f   : > { %v1385_v59 = vadd.f32 %v1384_v57, %v1383_v55  ;;  %v1425_v60 = vadd.f32 %v1424_v58, %v1423_v56  ;;  %744 = vrot.lane.b32.xlu0 %v1382_v53, %s1715_s6  ;;  %v932_v41 = vpop.permute.xlu0 %931  ;;  %v927_v43 = vpop.permute.xlu1 %926 }
 0x171   : > { %746 = vrot.lane.b32.xlu1 %v1385_v59, %s1715_s6 }
 0x173   : > { %v1386_v61 = vpop.f32.mrb[20].mxu0  ;;  %v1426_v62 = vpop.f32.mrb[20].mxu1  ;;  %882 = vrot.lane.b32.xlu0 %v1422_v54, %s1716_s7 }
 0x174   : > { %v1387_v63 = vpop.f32.mrb[21].mxu0  ;;  %v1427_v0 = vpop.f32.mrb[21].mxu1 }
 0x175   : > { %v1388_v1 = vadd.f32 %v1387_v63, %v1386_v61  ;;  %v1428_v2 = vadd.f32 %v1427_v0, %v1426_v62  ;;  %v1389_v3 = vpop.f32.mrb[22].mxu0  ;;  %v1429_v4 = vpop.f32.mrb[22].mxu1  ;;  %884 = vrot.lane.b32.xlu1 %v1425_v60, %s1716_s7 }
 0x176   : > { %v1390_v5 = vpop.f32.mrb[23].mxu0  ;;  %v1430_v7 = vpop.f32.mrb[23].mxu1 }
 0x177   : > { %v1391_v8 = vadd.f32 %v1390_v5, %v1389_v3  ;;  %v1431_v9 = vadd.f32 %v1430_v7, %v1429_v4  ;;  %748 = vrot.lane.b32.xlu0 %v1388_v1, %s1715_s6  ;;  %v2077_v44 = vpop.permute.xlu0 %941  ;;  %v2079_v45 = vpop.permute.xlu1 %936 }
 0x179   : > { %886 = vrot.lane.b32.xlu1 %v1428_v2, %s1716_s7 }
 0x17b   : > { %v1392_v10 = vpop.f32.mrb[24].mxu0  ;;  %v1432_v11 = vpop.f32.mrb[24].mxu1  ;;  %888 = vrot.lane.b32.xlu0 %v1431_v9, %s1716_s7 }
 0x17c   : > { %v1393_v13 = vpop.f32.mrb[25].mxu0  ;;  %v1433_v14 = vpop.f32.mrb[25].mxu1 }
 0x17d   : > { %v1394_v15 = vadd.f32 %v1393_v13, %v1392_v10  ;;  %v1434_v16 = vadd.f32 %v1433_v14, %v1432_v11  ;;  %v1395_v17 = vpop.f32.mrb[26].mxu0  ;;  %v1435_v19 = vpop.f32.mrb[26].mxu1  ;;  %750 = vrot.lane.b32.xlu1 %v1391_v8, %s1715_s6 }
 0x17e   : > { %v1396_v20 = vpop.f32.mrb[27].mxu0  ;;  %v1436_v21 = vpop.f32.mrb[27].mxu1 }
 0x17f   : > { %v1397_v22 = vadd.f32 %v1396_v20, %v1395_v17  ;;  %v1437_v23 = vadd.f32 %v1436_v21, %v1435_v19  ;;  %752 = vrot.lane.b32.xlu0 %v1394_v15, %s1715_s6  ;;  %v2081_v46 = vpop.permute.xlu0 %951  ;;  %v2083_v47 = vpop.permute.xlu1 %946 }
 0x181   : > { %890 = vrot.lane.b32.xlu1 %v1434_v16, %s1716_s7 }
 0x183   : > { %v1398_v25 = vpop.f32.mrb[28].mxu0  ;;  %892 = vrot.lane.b32.xlu0 %v1437_v23, %s1716_s7  ;;  %v1438_v26 = vpop.f32.mrb[28].mxu1 }
 0x184   : > { %v1399_v27 = vpop.f32.mrb[29].mxu0  ;;  %v1439_v28 = vpop.f32.mrb[29].mxu1 }
 0x185   : > { %v1400_v29 = vadd.f32 %v1399_v27, %v1398_v25  ;;  %v1401_v31 = vpop.f32.mrb[30].mxu0  ;;  %754 = vrot.lane.b32.xlu1 %v1397_v22, %s1715_s6  ;;  %v1440_v32 = vadd.f32 %v1439_v28, %v1438_v26  ;;  %v1441_v33 = vpop.f32.mrb[30].mxu1 }
 0x186   : > { %v1402_v34 = vpop.f32.mrb[31].mxu0  ;;  %v1442_v35 = vpop.f32.mrb[31].mxu1 }
 0x187   : > { %v1403_v37 = vadd.f32 %v1402_v34, %v1401_v31  ;;  %756 = vrot.lane.b32.xlu0 %v1400_v29, %s1715_s6  ;;  %v1443_v38 = vadd.f32 %v1442_v35, %v1441_v33  ;;  %v978_v49 = vpop.permute.xlu0 %977  ;;  %v973_v50 = vpop.permute.xlu1 %972 }
 0x189   : > { %758 = vrot.lane.b32.xlu1 %v1403_v37, %s1715_s6 }
 0x18b   : > { %896 = vrot.lane.b32.xlu0 %v1443_v38, %s1716_s7  ;;  %v988_v51 = vpop.permute.xlu0 %987  ;;  %v983_v52 = vpop.permute.xlu1 %982 }
 0x18d   : > { %894 = vrot.lane.b32.xlu1 %v1440_v32, %s1716_s7 }
 0x18f   : > { %v2085_v53 = vpop.permute.xlu0 %997  ;;  %v2087_v54 = vpop.permute.xlu1 %992 }
 0x193   : > { %v2089_v55 = vpop.permute.xlu0 %1007  ;;  %v2091_v56 = vpop.permute.xlu1 %1002 }
 0x1c1   : > { %v510_v57 = vpop.permute.xlu0 %509 }
 0x1c2   : > { %v600_v2 = vadd.f32 %v2037_v6, %v510_v57 }
 0x1c5   : > { %v512_v59 = vpop.permute.xlu0 %511 }
 0x1c6   : > { %v603_v4 = vadd.f32 %v2039_v12, %v512_v59  ;;  %v1237_v12 = vld [vmem:[%s2171_s2] ss:$0 sm:$0xff] }
 0x1c9   : > { %v514_v58 = vpop.permute.xlu1 %513 }
 0x1ca   : > { %v608_v11 = vadd.f32 %v2043_v18, %v514_v58 }
 0x1cd   : > { %v516_v60 = vpop.permute.xlu1 %515 }
 0x1ce   : > { %v611_v25 = vadd.f32 %v2045_v24, %v516_v60 }
 0x1d1   : > { %v518_v61 = vpop.permute.xlu0 %517 }
 0x1d2   : > { %v616_v28 = vadd.f32 %v2049_v30, %v518_v61 }
 0x1d3   : > { %v520_v62 = vpop.permute.xlu1 %519 }
 0x1d9   : > { %v522_v63 = vpop.permute.xlu0 %521 }
 0x1db   : > { %v524_v0 = vpop.permute.xlu1 %523 }
 0x1dc   : > { %v627_v60 = vadd.f32 %v2057_v48, %v524_v0 }
 0x1e1   : > { %v745_v1 = vpop.permute.xlu0 %744 }
 0x1e2   : > { %v760_v5 = vadd.f32 %v745_v1, %v600_v2 }
 0x1e3   : > { %v747_v3 = vpop.permute.xlu1 %746 }
 0x1e4   : > { %v761_v8 = vadd.f32 %v747_v3, %v603_v4 }
 0x1e5   : > { %v883_v7 = vpop.permute.xlu0 %882 }
 0x1e6   : > { %v898_v9 = vadd.f32 %v883_v7, %v760_v5  ;;  %v624_v5 = vadd.f32 %v2055_v42, %v522_v63 }
 0x1e7   : > { %v885_v10 = vpop.permute.xlu1 %884 }
 0x1e8   : > { %v954_v13 = vmul.f32 %v917_v39, %v898_v9  ;;  %v899_v14 = vadd.f32 %v885_v10, %v761_v8 }
 0x1e9   : > { %v749_v15 = vpop.permute.xlu0 %748 }
 0x1ea   : > { %v1010_v16 = vadd.f32 %v973_v50, %v954_v13  ;;  %v955_v17 = vmul.f32 %v922_v40, %v899_v14  ;;  %v762_v19 = vadd.f32 %v749_v15, %v608_v11 }
 0x1eb   : > { %v887_v20 = vpop.permute.xlu1 %886 }
 0x1ec   : > { %v1018_v21 = vmax.f32 %v1010_v16, 0.0  ;;  %v1011_v6 = vadd.f32 %v978_v49, %v955_v17  ;;  %v900_v22 = vadd.f32 %v887_v20, %v762_v19 }
 0x1ed   : > { %v889_v23 = vpop.permute.xlu0 %888 }
 0x1ee   : > { %v1019_v26 = vmax.f32 %v1011_v6, 0.0  ;;  %v956_v18 = vmul.f32 %v927_v43, %v900_v22  ;;  %v1033_v29 = vmul.f32 %v1237_v12, %v1018_v21  ;;  %v619_v43 = vadd.f32 %v2051_v36, %v520_v62 }
 0x1ef   : > { %v751_v27 = vpop.permute.xlu1 %750 }
 0x1f0   : > { %v1034_v31 = vmul.f32 %v1237_v12, %v1019_v26  ;;  %v763_v32 = vadd.f32 %v751_v27, %v611_v25  ;;  %v1012_v35 = vadd.f32 %v983_v52, %v956_v18 }
 0x1f1   : > { %v753_v33 = vpop.permute.xlu0 %752 }
 0x1f2   : > { %v1264_v34 = vpack.c.bf16 %v1034_v31, %v1033_v29  ;;  %v901_v37 = vadd.f32 %v889_v23, %v763_v32  ;;  %v764_v38 = vadd.f32 %v753_v33, %v616_v28  ;;  %v1020_v50 = vmax.f32 %v1012_v35, 0.0 }
 0x1f3   : > { %v891_v39 = vpop.permute.xlu1 %890 }
 0x1f4   : > { %1265 = vst [vmem:[%s2102_s13] sm:$0xff] %v1264_v34   ;;  %v957_v24 = vmul.f32 %v932_v41, %v901_v37  ;;  %v902_v40 = vadd.f32 %v891_v39, %v764_v38  ;;  %v1035_v1 = vmul.f32 %v1237_v12, %v1020_v50 }
 0x1f5   : > { %v893_v49 = vpop.permute.xlu0 %892 }
 0x1f6   : > { %v1013_v30 = vadd.f32 %v988_v51, %v957_v24  ;;  %v958_v57 = vmul.f32 %v2079_v45, %v902_v40 }
 0x1f7   : > { %v755_v58 = vpop.permute.xlu1 %754 }
 0x1f8   : > { %v1021_v59 = vmax.f32 %v1013_v30, 0.0  ;;  %v765_v52 = vadd.f32 %v755_v58, %v619_v43  ;;  %v1014_v3 = vadd.f32 %v2087_v54, %v958_v57 }
 0x1f9   : > { %v757_v61 = vpop.permute.xlu0 %756 }
 0x1fa   : > { %v1036_v2 = vmul.f32 %v1237_v12, %v1021_v59  ;;  %v903_v41 = vadd.f32 %v893_v49, %v765_v52  ;;  %v1022_v7 = vmax.f32 %v1014_v3, 0.0  ;;  %v766_v48 = vadd.f32 %v757_v61, %v624_v5 }
 0x1fb   : > { %v759_v4 = vpop.permute.xlu1 %758 }
 0x1fc   : > { %v1269_v36 = vpack.c.bf16 %v1036_v2, %v1035_v1  ;;  %v959_v51 = vmul.f32 %v2077_v44, %v903_v41  ;;  %v767_v62 = vadd.f32 %v759_v4, %v627_v60  ;;  %v1037_v42 = vmul.f32 %v1237_v12, %v1022_v7 }
 0x1fd   : > { %v897_v45 = vpop.permute.xlu0 %896 }
 0x1fe   : > { %1281 = vst [vmem:[%s2102_s13 + $0x8] sm:$0xff] %v1269_v36   ;;  %v1015_v8 = vadd.f32 %v2085_v53, %v959_v51  ;;  %v905_v0 = vadd.f32 %v897_v45, %v767_v62 }
 0x1ff   : > { %v895_v9 = vpop.permute.xlu1 %894 }
 0x200   : > { %v1023_v54 = vmax.f32 %v1015_v8, 0.0  ;;  %v961_v10 = vmul.f32 %v2081_v46, %v905_v0  ;;  %v904_v11 = vadd.f32 %v895_v9, %v766_v48 }
 0x202   : > { %v1038_v63 = vmul.f32 %v1237_v12, %v1023_v54  ;;  %v1017_v44 = vadd.f32 %v2089_v55, %v961_v10  ;;  %v960_v13 = vmul.f32 %v2083_v47, %v904_v11 }
 0x204   : > { %v1274_v14 = vpack.c.bf16 %v1038_v63, %v1037_v42  ;;  %v1025_v53 = vmax.f32 %v1017_v44, 0.0  ;;  %v1016_v15 = vadd.f32 %v2091_v56, %v960_v13 }
 0x206   : > { %1282 = vst [vmem:[%s2102_s13 + $0x10] sm:$0xff] %v1274_v14   ;;  %v1024_v16 = vmax.f32 %v1016_v15, 0.0  ;;  %v1040_v17 = vmul.f32 %v1237_v12, %v1025_v53 }
 0x208   : > { %v1039_v46 = vmul.f32 %v1237_v12, %v1024_v16 }
 0x20a   : > { %v1279_v47 = vpack.c.bf16 %v1040_v17, %v1039_v46 }
 0x20c   : > { %1283 = vst [vmem:[%s2102_s13 + $0x18] sm:$0xff] %v1279_v47  }
 0x20d   : > { %1648 = shalt.err (!%p1645_p7)
}
 0x20e   : > { %s1649_s6 = scalar_lea.hbm %s2123_s11, 512  ;;  %s1653_s10 = scalar_lea.hbm %s2174_s5, 2048 }
 0x20f   : > { %p1650_p9 = scmp.ne.s32.totalorder %s2123_s11, %s1649_s6  ;;  %p1654_p5 = scmp.lt.u32.totalorder %s2123_s11, %s2174_s5 }
 0x210   : > { %p1655_p10 = scmp.lt.u32.totalorder %s1653_s10, %s1649_s6  ;;  %p1657_p1 = scmp.lt.u32.totalorder %s1649_s6, %s2123_s11 }
 0x211   : > { %p1651_p11 = pnand %p1650_p9, %p1833_p12 }
 0x212   : > { %p1656_p2 = por %p1655_p10, %p1654_p5 }
 0x213   : > { %p1652_p0 = pneg %p1651_p11 }
 0x214   : > { %p1658_p4 = por %p1657_p1, %p1656_p2 }
 0x216   : > { %p1659_p6 = pnand %p1658_p4, %p1652_p0 }
 0x218   : > { %1662 = shalt.err (!%p1659_p6)
}
 0x219   : > { %s1718_s28 = smov 64   ;;  %s1719_s17 = smov 4  }
 0x21a   : > { %1450 = dma.vmem_to_hbm [thread:$0]  (%p1833_p12), %s2125_s16, 512, %s2123_s11, %s1082_s12, %s1718_s28, %s1718_s28, %s1719_s17  }
 0x21b PF: > { %p1467_p8 = scmp.ge.s32.totalorder %s1705_s21, 2  ;;  %s1110_s27 = sand.u32 1, %s1693_s18  }
 0x21c   : > { %p2189_p13 = scmp.ne.s32.totalorder %s2179_s25, 0  ;;  %s1111_s24 = scalar_lea.sflag [#allocation4], %s1110_s27 }
 0x21e   : > { %p1461_p3 = pnand %p1467_p8, %p2189_p13 }
 0x220   : > { %1688 = dma.done.wait (!%p1461_p3), %s1111_s24, 512  }
 0x221   : > { %1690 = vsyncadd (!%p1461_p3), %s1111_s24, 4294966784  ;;  %p19_p7 = scmp.ge.s32.totalorder %s1803_s30, 6   ;;  %s2190_s18 = smov %s1697_s19 }
 0x222   : > { %s2191_s19 = smov %s1701_s20  ;;  %s2192_s20 = smov %s1829_s8 }
 0x223   : > { %s2193_s21 = smov %s1803_s30  ;;  %21 = sbr.rel (!%p19_p7) target bundleno = 6 (0x6), region = 92 }
 0x22a   :  { %1116 = vsyncpa [#allocation3], 1 }
 0x22b   :  { %1118 = vsyncpa [#allocation3 + $0x1], 1 }
 0x22c   :  { %1119 = vsyncpa [#allocation6], 1 }
 0x22d   :  { %1120 = vsyncpa [#allocation4], 1 }
 0x22e   :  { %1122 = vsyncpa [#allocation4 + $0x1], 1 }

</bundles_post_ra>
